<compile_context>
chip_gen: v6e
topology: v6e:2x2x1
jax: 0.10.0
libtpu: 0.0.40
codegen_flags: <defaults>
</compile_context>

<pallas_src>
import functools

import jax
import jax.numpy as jnp
from jax.experimental import pallas as pl
from jax.experimental.pallas import tpu as pltpu

LN_EPS = 1e-5  # nn.LayerNorm default eps


def _ffn_kernel(x_ref, w1_ref, b1_ref, w2_ref, b2_ref, g_ref, beta_ref,
                o_ref, acc_ref):
    # x_ref: (tm, D)   w1_ref: (D, tf)   b1_ref: (1, tf)
    # w2_ref: (tf, D)  b2_ref: (1, D)    g_ref/beta_ref: (1, D)
    # acc_ref: (tm, D) f32 accumulator over the F (ffn) grid axis.
    f = pl.program_id(1)

    @pl.when(f == 0)
    def _():
        acc_ref[...] = jnp.zeros_like(acc_ref)

    xv = x_ref[...]                        # load the x tile once
    x_mm = xv.astype(w1_ref.dtype)         # MXU operand dtype (bf16 or f32)

    # w_1 chunk -> bias -> ReLU   (f32 accumulation on the MXU)
    h = jnp.dot(x_mm, w1_ref[...], preferred_element_type=jnp.float32) + b1_ref[...]
    h = jnp.maximum(h, 0.0)

    # partial w_2 contribution of this F chunk
    acc_ref[...] += jnp.dot(h.astype(w2_ref.dtype), w2_ref[...],
                            preferred_element_type=jnp.float32)

    @pl.when(f == pl.num_programs(1) - 1)
    def _():
        # dropout(p=0.0) == identity; bias, residual add and LayerNorm in f32.
        # TODO(synk): dropout with p > 0 would need pltpu.prng_seed /
        # prng_random_bits; the module default p=0.0 folds to identity.
        z = xv.astype(jnp.float32) + acc_ref[...] + b2_ref[...]
        mean = jnp.mean(z, axis=-1, keepdims=True)
        zc = z - mean
        var = jnp.mean(zc * zc, axis=-1, keepdims=True)
        zn = zc * jax.lax.rsqrt(var + LN_EPS)
        o_ref[...] = (zn * g_ref[...] + beta_ref[...]).astype(o_ref.dtype)


def _round_up(x, m):
    return ((x + m - 1) // m) * m


def _pick_tm(n_tok, tm_default):
    """Row tile: big enough to amortize per-step overhead, small enough that
    grid_m >= 2 (keeps both v7x TensorCores busy) and tiny/decode-sized calls
    don't pad up to a 512-row tile."""
    align = 128 if n_tok >= 256 else 8
    return max(8, min(tm_default, _round_up(pl.cdiv(n_tok, 2), align)))


def _pick_tf(F):
    """FFN-axis tile: stream (D, tf)/(tf, D) weight slabs for large F."""
    if F <= 2048:
        return F
    for tf in (2048, 1024, 512, 256, 128):
        if F % tf == 0:
            return tf
    return F  # non-128-multiple F: keep fully resident as a last resort


@functools.lru_cache(maxsize=1)
def _vmem_cap_bytes():
    try:
        cap = int(pltpu.get_tpu_info().vmem_capacity_bytes)
    except Exception:
        cap = 64 * 1024 * 1024
    # Leave headroom for Mosaic internal scratch: ~56 MiB usable on v7x (64 MiB
    # physical), ~112 MiB on v5e/v6e (128 MiB physical).
    return cap - max(8 * 1024 * 1024, cap // 8)


def _make_spec(block_shape, index_map, single_buffer):
    """BlockSpec; constant-index operands ask for a single pipeline buffer."""
    if single_buffer and hasattr(pl, "Buffered"):
        try:
            return pl.BlockSpec(block_shape, index_map,
                                pipeline_mode=pl.Buffered(1))
        except TypeError:  # older jax without pipeline_mode
            pass
    return pl.BlockSpec(block_shape, index_map)


@functools.partial(jax.jit,
                   static_argnames=("tm", "use_bf16_matmul", "single_buffer"))
def _ffn_impl(x, w1, b1, w2, b2, gamma, beta, *, tm, use_bf16_matmul,
              single_buffer):
    B, S, D = x.shape
    F = w1.shape[1]
    assert D % 128 == 0 and F % 128 == 0, "model_dim/ffn_dim must be 128-multiples"
    n_tok = B * S

    x2 = x.reshape(n_tok, D)

    tm_eff = _pick_tm(n_tok, tm)
    grid_m = pl.cdiv(n_tok, tm_eff)
    n_pad = grid_m * tm_eff
    if n_pad != n_tok:
        x2 = jnp.pad(x2, ((0, n_pad - n_tok), (0, 0)))

    tf = _pick_tf(F)
    grid_f = pl.cdiv(F, tf)

    # MXU operand dtype: bf16 (f32 accumulate) by default; f32 is a
    # validation-only fallback (3-4x slower on the MXU, 2x weight bytes).
    mm_dtype = jnp.bfloat16 if use_bf16_matmul else w1.dtype
    w1_mm = w1.astype(mm_dtype)
    w2_mm = w2.astype(mm_dtype)

    itemsize_mm = jnp.dtype(mm_dtype).itemsize
    itemsize_x = jnp.dtype(x.dtype).itemsize

    sb_w = single_buffer and grid_f == 1   # weights constant only if one F step
    sb_v = single_buffer                   # b2 / gamma / beta are always constant
    nbuf_w = 1 if sb_w else 2

    # VMEM budget: weight slabs + double-buffered x/out tiles + accumulator +
    # in-kernel f32 temporaries, x1.3 margin, capped to hardware capacity.
    w_bytes = nbuf_w * ((D * tf + tf * D) * itemsize_mm + tf * 4)
    io_bytes = 2 * 2 * tm_eff * D * itemsize_x
    acc_bytes = tm_eff * D * 4
    tmp_bytes = tm_eff * tf * 6 + tm_eff * D * 12
    vec_bytes = (1 if sb_v else 2) * 3 * D * 4
    vmem_bytes = int(1.3 * (w_bytes + io_bytes + acc_bytes + tmp_bytes + vec_bytes))
    vmem_bytes = min(max(vmem_bytes, 32 * 1024 * 1024), _vmem_cap_bytes())

    cost = pl.CostEstimate(
        flops=4 * n_pad * D * F + 10 * n_pad * D,     # two GEMMs + elementwise/LN
        transcendentals=n_pad,                        # one rsqrt per token row
        bytes_accessed=(2 * n_pad * D * itemsize_x
                        + grid_m * 2 * D * F * itemsize_mm
                        + (2 * F + 6 * D) * 4),
    )

    out = pl.pallas_call(
        _ffn_kernel,
        out_shape=jax.ShapeDtypeStruct((n_pad, D), x.dtype),
        grid_spec=pltpu.PrefetchScalarGridSpec(
            num_scalar_prefetch=0,
            grid=(grid_m, grid_f),
            in_specs=[
                pl.BlockSpec((tm_eff, D), lambda i, f: (i, 0)),     # x rows
                _make_spec((D, tf), lambda i, f: (0, f), sb_w),     # w1 slab
                _make_spec((1, tf), lambda i, f: (0, f), sb_w),     # b1 slab
                _make_spec((tf, D), lambda i, f: (f, 0), sb_w),     # w2 slab
                _make_spec((1, D), lambda i, f: (0, 0), sb_v),      # b2
                _make_spec((1, D), lambda i, f: (0, 0), sb_v),      # ln weight
                _make_spec((1, D), lambda i, f: (0, 0), sb_v),      # ln bias
            ],
            out_specs=pl.BlockSpec((tm_eff, D), lambda i, f: (i, 0)),
            scratch_shapes=[pltpu.VMEM((tm_eff, D), jnp.float32)],
        ),
        compiler_params=pltpu.CompilerParams(
            dimension_semantics=("parallel", "arbitrary"),
            vmem_limit_bytes=vmem_bytes,
        ),
        cost_estimate=cost,
    )(x2, w1_mm, b1.reshape(1, F), w2_mm, b2.reshape(1, D),
      gamma.reshape(1, D), beta.reshape(1, D))

    if n_pad != n_tok:
        out = out[:n_tok]
    return out.reshape(B, S, D)


_SINGLE_BUFFER_OK = True  # flipped off if pipeline_mode=pl.Buffered(1) is rejected


def positional_wise_ffn(x, w1, b1, w2, b2, gamma, beta, *, tm=512,
                        use_bf16_matmul=True):
    """x: (B, S, D). w1: (D, F), b1: (F,), w2: (F, D), b2: (D,), gamma/beta: (D,)."""
    global _SINGLE_BUFFER_OK
    if _SINGLE_BUFFER_OK:
        try:
            return _ffn_impl(x, w1, b1, w2, b2, gamma, beta, tm=tm,
                             use_bf16_matmul=use_bf16_matmul, single_buffer=True)
        except Exception:
            _SINGLE_BUFFER_OK = False   # backend rejected single buffering
    return _ffn_impl(x, w1, b1, w2, b2, gamma, beta, tm=tm,
                     use_bf16_matmul=use_bf16_matmul, single_buffer=False)


def _reference(x, w1, b1, w2, b2, gamma, beta):
    h = jnp.maximum(x @ w1 + b1, 0.0)
    y = h @ w2 + b2
    z = x + y
    mean = jnp.mean(z, axis=-1, keepdims=True)
    var = jnp.mean((z - mean) ** 2, axis=-1, keepdims=True)
    zn = (z - mean) / jnp.sqrt(var + LN_EPS)
    return zn * gamma + beta


if __name__ == "__main__":
    # Small shapes consistent with the module (model_dim x ffn_dim FFN over a
    # (batch, seq, model_dim) input).
    batch, seq, model_dim, ffn_dim = 2, 8, 128, 256

    key = jax.random.PRNGKey(0)
    kx, k1, kb1, k2, kb2 = jax.random.split(key, 5)

    x = jax.random.normal(kx, (batch, seq, model_dim), dtype=jnp.float32)

    # nn.Linear-style deterministic init: U(-1/sqrt(fan_in), 1/sqrt(fan_in)).
    lim1 = 1.0 / (model_dim ** 0.5)
    lim2 = 1.0 / (ffn_dim ** 0.5)
    w1 = jax.random.uniform(k1, (model_dim, ffn_dim), jnp.float32, -lim1, lim1)
    b1 = jax.random.uniform(kb1, (ffn_dim,), jnp.float32, -lim1, lim1)
    w2 = jax.random.uniform(k2, (ffn_dim, model_dim), jnp.float32, -lim2, lim2)
    b2 = jax.random.uniform(kb2, (model_dim,), jnp.float32, -lim2, lim2)
    # nn.LayerNorm default init: weight=1, bias=0.
    gamma = jnp.ones((model_dim,), jnp.float32)
    beta = jnp.zeros((model_dim,), jnp.float32)

    ref = _reference(x, w1, b1, w2, b2, gamma, beta)

    # Exact (f32 MXU operand) validation path: tight tolerance.
    out_f32 = positional_wise_ffn(x, w1, b1, w2, b2, gamma, beta,
                                  use_bf16_matmul=False)
    out_f32 = jax.block_until_ready(out_f32)
    assert out_f32.shape == (batch, seq, model_dim)
    assert jnp.allclose(out_f32, ref, atol=1e-4, rtol=1e-4), "f32 path mismatch"

    # Default fast path: bf16 MXU operands, f32 accumulate / residual / LayerNorm.
    out = positional_wise_ffn(x, w1, b1, w2, b2, gamma, beta)
    out = jax.block_until_ready(out)
    assert out.shape == (batch, seq, model_dim)
    assert jnp.allclose(out, ref, atol=5e-2, rtol=5e-2), "bf16 path mismatch"

    print("KERNEL_OK")
</pallas_src>

<mosaic_0001>
module attributes {stable_mosaic.version = 11 : i64} {
  func.func @_ffn_kernel(%arg0: i32, %arg1: i32, %arg2: memref<8x128xf32, #tpu.memory_space<vmem>>, %arg3: memref<128x256xf32, #tpu.memory_space<vmem>>, %arg4: memref<1x256xf32, #tpu.memory_space<vmem>>, %arg5: memref<256x128xf32, #tpu.memory_space<vmem>>, %arg6: memref<1x128xf32, #tpu.memory_space<vmem>>, %arg7: memref<1x128xf32, #tpu.memory_space<vmem>>, %arg8: memref<1x128xf32, #tpu.memory_space<vmem>>, %arg9: memref<8x128xf32, #tpu.memory_space<vmem>>, %arg10: memref<8x128xf32, #tpu.memory_space<vmem>>) attributes {dimension_semantics = [#tpu.dimension_semantics<parallel>, #tpu.dimension_semantics<arbitrary>], iteration_bounds = array<i64: 2, 1>, scalar_prefetch = 0 : i64, scratch_operands = 1 : i64, tpu.core_type = #tpu.core_type<tc>, window_params = [{transform_indices = @transform_0, window_bounds = array<i64: 8, 128>}, {pipeline_mode = #tpu.pipeline_mode<synchronous>, transform_indices = @transform_1, window_bounds = array<i64: 128, 256>}, {pipeline_mode = #tpu.pipeline_mode<synchronous>, transform_indices = @transform_2, window_bounds = array<i64: 1, 256>}, {pipeline_mode = #tpu.pipeline_mode<synchronous>, transform_indices = @transform_3, window_bounds = array<i64: 256, 128>}, {pipeline_mode = #tpu.pipeline_mode<synchronous>, transform_indices = @transform_4, window_bounds = array<i64: 1, 128>}, {pipeline_mode = #tpu.pipeline_mode<synchronous>, transform_indices = @transform_5, window_bounds = array<i64: 1, 128>}, {pipeline_mode = #tpu.pipeline_mode<synchronous>, transform_indices = @transform_6, window_bounds = array<i64: 1, 128>}, {transform_indices = @transform_7, window_bounds = array<i64: 8, 128>}]} {
    %c0_i32 = arith.constant 0 : i32
    %0 = arith.cmpi eq, %arg1, %c0_i32 : i32
    %1 = arith.extui %0 : i1 to i32
    %c0_i32_0 = arith.constant 0 : i32
    %2 = arith.cmpi ne, %1, %c0_i32_0 : i32
    scf.if %2 {
      %cst_16 = arith.constant 0.000000e+00 : f32
      %19 = vector.broadcast %cst_16 : f32 to vector<8x128xf32>
      %c0_17 = arith.constant 0 : index
      %c0_18 = arith.constant 0 : index
      %20 = vector.load %arg10[%c0_17, %c0_18] : memref<8x128xf32, #tpu.memory_space<vmem>>, vector<8x128xf32>
      tpu.vector_store %arg10[%c0_17, %c0_18], %19 {strides = array<i32>} : memref<8x128xf32, #tpu.memory_space<vmem>>, vector<8x128xf32>,
    } else {
    }
    %c0 = arith.constant 0 : index
    %c0_1 = arith.constant 0 : index
    %3 = vector.load %arg2[%c0, %c0_1] : memref<8x128xf32, #tpu.memory_space<vmem>>, vector<8x128xf32>
    %c0_2 = arith.constant 0 : index
    %c0_3 = arith.constant 0 : index
    %4 = vector.load %arg3[%c0_2, %c0_3] : memref<128x256xf32, #tpu.memory_space<vmem>>, vector<128x256xf32>
    %cst = arith.constant dense<0.000000e+00> : vector<8x256xf32>
    %5 = tpu.matmul %3, %4, %cst {dimension_numbers = #tpu.dot_dimension_numbers<[1], [0], [0], [1], [0, 0, 1, 1], [], []>} : vector<8x128xf32>, vector<128x256xf32>, vector<8x256xf32> -> vector<8x256xf32>
    %c0_4 = arith.constant 0 : index
    %c0_5 = arith.constant 0 : index
    %6 = vector.load %arg4[%c0_4, %c0_5] : memref<1x256xf32, #tpu.memory_space<vmem>>, vector<1x256xf32>
    %7 = vector.broadcast %6 : vector<1x256xf32> to vector<8x256xf32>
    %8 = arith.addf %5, %7 : vector<8x256xf32>
    %cst_6 = arith.constant 0.000000e+00 : f32
    %9 = vector.broadcast %cst_6 : f32 to vector<8x256xf32>
    %10 = arith.maximumf %8, %9 : vector<8x256xf32>
    %c0_7 = arith.constant 0 : index
    %c0_8 = arith.constant 0 : index
    %11 = vector.load %arg10[%c0_7, %c0_8] : memref<8x128xf32, #tpu.memory_space<vmem>>, vector<8x128xf32>
    %c0_9 = arith.constant 0 : index
    %c0_10 = arith.constant 0 : index
    %12 = vector.load %arg5[%c0_9, %c0_10] : memref<256x128xf32, #tpu.memory_space<vmem>>, vector<256x128xf32>
    %cst_11 = arith.constant dense<0.000000e+00> : vector<8x128xf32>
    %13 = tpu.matmul %10, %12, %cst_11 {dimension_numbers = #tpu.dot_dimension_numbers<[1], [0], [0], [1], [0, 0, 1, 1], [], []>} : vector<8x256xf32>, vector<256x128xf32>, vector<8x128xf32> -> vector<8x128xf32>
    %14 = arith.addf %11, %13 : vector<8x128xf32>
    %c0_12 = arith.constant 0 : index
    %c0_13 = arith.constant 0 : index
    %15 = vector.load %arg10[%c0_12, %c0_13] : memref<8x128xf32, #tpu.memory_space<vmem>>, vector<8x128xf32>
    tpu.vector_store %arg10[%c0_12, %c0_13], %14 {strides = array<i32>} : memref<8x128xf32, #tpu.memory_space<vmem>>, vector<8x128xf32>,
    %c0_i32_14 = arith.constant 0 : i32
    %16 = arith.cmpi eq, %arg1, %c0_i32_14 : i32
    %17 = arith.extui %16 : i1 to i32
    %c0_i32_15 = arith.constant 0 : i32
    %18 = arith.cmpi ne, %17, %c0_i32_15 : i32
    scf.if %18 {
      %c0_16 = arith.constant 0 : index
      %c0_17 = arith.constant 0 : index
      %19 = vector.load %arg10[%c0_16, %c0_17] : memref<8x128xf32, #tpu.memory_space<vmem>>, vector<8x128xf32>
      %20 = arith.addf %3, %19 : vector<8x128xf32>
      %c0_18 = arith.constant 0 : index
      %c0_19 = arith.constant 0 : index
      %21 = vector.load %arg6[%c0_18, %c0_19] : memref<1x128xf32, #tpu.memory_space<vmem>>, vector<1x128xf32>
      %22 = vector.broadcast %21 : vector<1x128xf32> to vector<8x128xf32>
      %23 = arith.addf %20, %22 : vector<8x128xf32>
      %cst_20 = arith.constant dense<0.000000e+00> : vector<8xf32>
      %24 = vector.multi_reduction <add>, %23, %cst_20 [1] : vector<8x128xf32> to vector<8xf32>
      %25 = vector.shape_cast %24 : vector<8xf32> to vector<8x1xf32>
      %cst_21 = arith.constant 1.280000e+02 : f32
      %26 = vector.broadcast %cst_21 : f32 to vector<8x1xf32>
      %27 = arith.divf %25, %26 : vector<8x1xf32>
      %28 = vector.broadcast %27 : vector<8x1xf32> to vector<8x128xf32>
      %29 = arith.subf %23, %28 : vector<8x128xf32>
      %30 = arith.mulf %29, %29 : vector<8x128xf32>
      %cst_22 = arith.constant dense<0.000000e+00> : vector<8xf32>
      %31 = vector.multi_reduction <add>, %30, %cst_22 [1] : vector<8x128xf32> to vector<8xf32>
      %32 = vector.shape_cast %31 : vector<8xf32> to vector<8x1xf32>
      %cst_23 = arith.constant 1.280000e+02 : f32
      %33 = vector.broadcast %cst_23 : f32 to vector<8x1xf32>
      %34 = arith.divf %32, %33 : vector<8x1xf32>
      %cst_24 = arith.constant 9.99999974E-6 : f32
      %35 = vector.broadcast %cst_24 : f32 to vector<8x1xf32>
      %36 = arith.addf %34, %35 : vector<8x1xf32>
      %37 = math.rsqrt %36 : vector<8x1xf32>
      %38 = vector.broadcast %37 : vector<8x1xf32> to vector<8x128xf32>
      %39 = arith.mulf %29, %38 : vector<8x128xf32>
      %c0_25 = arith.constant 0 : index
      %c0_26 = arith.constant 0 : index
      %40 = vector.load %arg7[%c0_25, %c0_26] : memref<1x128xf32, #tpu.memory_space<vmem>>, vector<1x128xf32>
      %41 = vector.broadcast %40 : vector<1x128xf32> to vector<8x128xf32>
      %42 = arith.mulf %39, %41 : vector<8x128xf32>
      %c0_27 = arith.constant 0 : index
      %c0_28 = arith.constant 0 : index
      %43 = vector.load %arg8[%c0_27, %c0_28] : memref<1x128xf32, #tpu.memory_space<vmem>>, vector<1x128xf32>
      %44 = vector.broadcast %43 : vector<1x128xf32> to vector<8x128xf32>
      %45 = arith.addf %42, %44 : vector<8x128xf32>
      %c0_29 = arith.constant 0 : index
      %c0_30 = arith.constant 0 : index
      %46 = vector.load %arg9[%c0_29, %c0_30] : memref<8x128xf32, #tpu.memory_space<vmem>>, vector<8x128xf32>
      tpu.vector_store %arg9[%c0_29, %c0_30], %45 {strides = array<i32>} : memref<8x128xf32, #tpu.memory_space<vmem>>, vector<8x128xf32>,
    } else {
    }
    return
  }
  func.func @transform_0(%arg0: i32, %arg1: i32) -> (i32, i32) {
    %c0_i32 = arith.constant 0 : i32
    %c0_i32_0 = arith.constant 0 : i32
    return %arg0, %c0_i32 : i32, i32
  }
  func.func @transform_1(%arg0: i32, %arg1: i32) -> (i32, i32) {
    %c0_i32 = arith.constant 0 : i32
    %c0_i32_0 = arith.constant 0 : i32
    return %c0_i32, %arg1 : i32, i32
  }
  func.func @transform_2(%arg0: i32, %arg1: i32) -> (i32, i32) {
    %c0_i32 = arith.constant 0 : i32
    %c0_i32_0 = arith.constant 0 : i32
    return %c0_i32, %arg1 : i32, i32
  }
  func.func @transform_3(%arg0: i32, %arg1: i32) -> (i32, i32) {
    %c0_i32 = arith.constant 0 : i32
    %c0_i32_0 = arith.constant 0 : i32
    return %arg1, %c0_i32 : i32, i32
  }
  func.func @transform_4(%arg0: i32, %arg1: i32) -> (i32, i32) {
    %c0_i32 = arith.constant 0 : i32
    %c0_i32_0 = arith.constant 0 : i32
    %c0_i32_1 = arith.constant 0 : i32
    return %c0_i32, %c0_i32_0 : i32, i32
  }
  func.func @transform_5(%arg0: i32, %arg1: i32) -> (i32, i32) {
    %c0_i32 = arith.constant 0 : i32
    %c0_i32_0 = arith.constant 0 : i32
    %c0_i32_1 = arith.constant 0 : i32
    return %c0_i32, %c0_i32_0 : i32, i32
  }
  func.func @transform_6(%arg0: i32, %arg1: i32) -> (i32, i32) {
    %c0_i32 = arith.constant 0 : i32
    %c0_i32_0 = arith.constant 0 : i32
    %c0_i32_1 = arith.constant 0 : i32
    return %c0_i32, %c0_i32_0 : i32, i32
  }
  func.func @transform_7(%arg0: i32, %arg1: i32) -> (i32, i32) {
    %c0_i32 = arith.constant 0 : i32
    %c0_i32_0 = arith.constant 0 : i32
    return %arg0, %c0_i32 : i32, i32
  }
}

module attributes {stable_mosaic.version = 11 : i64} {
  func.func @_ffn_kernel(%arg0: i32, %arg1: i32, %arg2: memref<8x128xf32, #tpu.memory_space<vmem>>, %arg3: memref<128x256xf32, #tpu.memory_space<vmem>>, %arg4: memref<1x256xf32, #tpu.memory_space<vmem>>, %arg5: memref<256x128xf32, #tpu.memory_space<vmem>>, %arg6: memref<1x128xf32, #tpu.memory_space<vmem>>, %arg7: memref<1x128xf32, #tpu.memory_space<vmem>>, %arg8: memref<1x128xf32, #tpu.memory_space<vmem>>, %arg9: memref<8x128xf32, #tpu.memory_space<vmem>>, %arg10: memref<8x128xf32, #tpu.memory_space<vmem>>) attributes {dimension_semantics = [#tpu.dimension_semantics<parallel>, #tpu.dimension_semantics<arbitrary>], iteration_bounds = array<i64: 2, 1>, scalar_prefetch = 0 : i64, scratch_operands = 1 : i64, tpu.core_type = #tpu.core_type<tc>, window_params = [{transform_indices = @transform_0, window_bounds = array<i64: 8, 128>}, {transform_indices = @transform_1, window_bounds = array<i64: 128, 256>}, {transform_indices = @transform_2, window_bounds = array<i64: 1, 256>}, {transform_indices = @transform_3, window_bounds = array<i64: 256, 128>}, {pipeline_mode = #tpu.pipeline_mode<synchronous>, transform_indices = @transform_4, window_bounds = array<i64: 1, 128>}, {pipeline_mode = #tpu.pipeline_mode<synchronous>, transform_indices = @transform_5, window_bounds = array<i64: 1, 128>}, {pipeline_mode = #tpu.pipeline_mode<synchronous>, transform_indices = @transform_6, window_bounds = array<i64: 1, 128>}, {transform_indices = @transform_7, window_bounds = array<i64: 8, 128>}]} {
    %c0_i32 = arith.constant 0 : i32
    %0 = arith.cmpi eq, %arg1, %c0_i32 : i32
    %1 = arith.extui %0 : i1 to i32
    %c0_i32_0 = arith.constant 0 : i32
    %2 = arith.cmpi ne, %1, %c0_i32_0 : i32
    scf.if %2 {
      %cst_16 = arith.constant 0.000000e+00 : f32
      %19 = vector.broadcast %cst_16 : f32 to vector<8x128xf32>
      %c0_17 = arith.constant 0 : index
      %c0_18 = arith.constant 0 : index
      %20 = vector.load %arg10[%c0_17, %c0_18] : memref<8x128xf32, #tpu.memory_space<vmem>>, vector<8x128xf32>
      tpu.vector_store %arg10[%c0_17, %c0_18], %19 {strides = array<i32>} : memref<8x128xf32, #tpu.memory_space<vmem>>, vector<8x128xf32>,
    } else {
    }
    %c0 = arith.constant 0 : index
    %c0_1 = arith.constant 0 : index
    %3 = vector.load %arg2[%c0, %c0_1] : memref<8x128xf32, #tpu.memory_space<vmem>>, vector<8x128xf32>
    %c0_2 = arith.constant 0 : index
    %c0_3 = arith.constant 0 : index
    %4 = vector.load %arg3[%c0_2, %c0_3] : memref<128x256xf32, #tpu.memory_space<vmem>>, vector<128x256xf32>
    %cst = arith.constant dense<0.000000e+00> : vector<8x256xf32>
    %5 = tpu.matmul %3, %4, %cst {dimension_numbers = #tpu.dot_dimension_numbers<[1], [0], [0], [1], [0, 0, 1, 1], [], []>} : vector<8x128xf32>, vector<128x256xf32>, vector<8x256xf32> -> vector<8x256xf32>
    %c0_4 = arith.constant 0 : index
    %c0_5 = arith.constant 0 : index
    %6 = vector.load %arg4[%c0_4, %c0_5] : memref<1x256xf32, #tpu.memory_space<vmem>>, vector<1x256xf32>
    %7 = vector.broadcast %6 : vector<1x256xf32> to vector<8x256xf32>
    %8 = arith.addf %5, %7 : vector<8x256xf32>
    %cst_6 = arith.constant 0.000000e+00 : f32
    %9 = vector.broadcast %cst_6 : f32 to vector<8x256xf32>
    %10 = arith.maximumf %8, %9 : vector<8x256xf32>
    %c0_7 = arith.constant 0 : index
    %c0_8 = arith.constant 0 : index
    %11 = vector.load %arg10[%c0_7, %c0_8] : memref<8x128xf32, #tpu.memory_space<vmem>>, vector<8x128xf32>
    %c0_9 = arith.constant 0 : index
    %c0_10 = arith.constant 0 : index
    %12 = vector.load %arg5[%c0_9, %c0_10] : memref<256x128xf32, #tpu.memory_space<vmem>>, vector<256x128xf32>
    %cst_11 = arith.constant dense<0.000000e+00> : vector<8x128xf32>
    %13 = tpu.matmul %10, %12, %cst_11 {dimension_numbers = #tpu.dot_dimension_numbers<[1], [0], [0], [1], [0, 0, 1, 1], [], []>} : vector<8x256xf32>, vector<256x128xf32>, vector<8x128xf32> -> vector<8x128xf32>
    %14 = arith.addf %11, %13 : vector<8x128xf32>
    %c0_12 = arith.constant 0 : index
    %c0_13 = arith.constant 0 : index
    %15 = vector.load %arg10[%c0_12, %c0_13] : memref<8x128xf32, #tpu.memory_space<vmem>>, vector<8x128xf32>
    tpu.vector_store %arg10[%c0_12, %c0_13], %14 {strides = array<i32>} : memref<8x128xf32, #tpu.memory_space<vmem>>, vector<8x128xf32>,
    %c0_i32_14 = arith.constant 0 : i32
    %16 = arith.cmpi eq, %arg1, %c0_i32_14 : i32
    %17 = arith.extui %16 : i1 to i32
    %c0_i32_15 = arith.constant 0 : i32
    %18 = arith.cmpi ne, %17, %c0_i32_15 : i32
    scf.if %18 {
      %c0_16 = arith.constant 0 : index
      %c0_17 = arith.constant 0 : index
      %19 = vector.load %arg10[%c0_16, %c0_17] : memref<8x128xf32, #tpu.memory_space<vmem>>, vector<8x128xf32>
      %20 = arith.addf %3, %19 : vector<8x128xf32>
      %c0_18 = arith.constant 0 : index
      %c0_19 = arith.constant 0 : index
      %21 = vector.load %arg6[%c0_18, %c0_19] : memref<1x128xf32, #tpu.memory_space<vmem>>, vector<1x128xf32>
      %22 = vector.broadcast %21 : vector<1x128xf32> to vector<8x128xf32>
      %23 = arith.addf %20, %22 : vector<8x128xf32>
      %cst_20 = arith.constant dense<0.000000e+00> : vector<8xf32>
      %24 = vector.multi_reduction <add>, %23, %cst_20 [1] : vector<8x128xf32> to vector<8xf32>
      %25 = vector.shape_cast %24 : vector<8xf32> to vector<8x1xf32>
      %cst_21 = arith.constant 1.280000e+02 : f32
      %26 = vector.broadcast %cst_21 : f32 to vector<8x1xf32>
      %27 = arith.divf %25, %26 : vector<8x1xf32>
      %28 = vector.broadcast %27 : vector<8x1xf32> to vector<8x128xf32>
      %29 = arith.subf %23, %28 : vector<8x128xf32>
      %30 = arith.mulf %29, %29 : vector<8x128xf32>
      %cst_22 = arith.constant dense<0.000000e+00> : vector<8xf32>
      %31 = vector.multi_reduction <add>, %30, %cst_22 [1] : vector<8x128xf32> to vector<8xf32>
      %32 = vector.shape_cast %31 : vector<8xf32> to vector<8x1xf32>
      %cst_23 = arith.constant 1.280000e+02 : f32
      %33 = vector.broadcast %cst_23 : f32 to vector<8x1xf32>
      %34 = arith.divf %32, %33 : vector<8x1xf32>
      %cst_24 = arith.constant 9.99999974E-6 : f32
      %35 = vector.broadcast %cst_24 : f32 to vector<8x1xf32>
      %36 = arith.addf %34, %35 : vector<8x1xf32>
      %37 = math.rsqrt %36 : vector<8x1xf32>
      %38 = vector.broadcast %37 : vector<8x1xf32> to vector<8x128xf32>
      %39 = arith.mulf %29, %38 : vector<8x128xf32>
      %c0_25 = arith.constant 0 : index
      %c0_26 = arith.constant 0 : index
      %40 = vector.load %arg7[%c0_25, %c0_26] : memref<1x128xf32, #tpu.memory_space<vmem>>, vector<1x128xf32>
      %41 = vector.broadcast %40 : vector<1x128xf32> to vector<8x128xf32>
      %42 = arith.mulf %39, %41 : vector<8x128xf32>
      %c0_27 = arith.constant 0 : index
      %c0_28 = arith.constant 0 : index
      %43 = vector.load %arg8[%c0_27, %c0_28] : memref<1x128xf32, #tpu.memory_space<vmem>>, vector<1x128xf32>
      %44 = vector.broadcast %43 : vector<1x128xf32> to vector<8x128xf32>
      %45 = arith.addf %42, %44 : vector<8x128xf32>
      %c0_29 = arith.constant 0 : index
      %c0_30 = arith.constant 0 : index
      %46 = vector.load %arg9[%c0_29, %c0_30] : memref<8x128xf32, #tpu.memory_space<vmem>>, vector<8x128xf32>
      tpu.vector_store %arg9[%c0_29, %c0_30], %45 {strides = array<i32>} : memref<8x128xf32, #tpu.memory_space<vmem>>, vector<8x128xf32>,
    } else {
    }
    return
  }
  func.func @transform_0(%arg0: i32, %arg1: i32) -> (i32, i32) {
    %c0_i32 = arith.constant 0 : i32
    %c0_i32_0 = arith.constant 0 : i32
    return %arg0, %c0_i32 : i32, i32
  }
  func.func @transform_1(%arg0: i32, %arg1: i32) -> (i32, i32) {
    %c0_i32 = arith.constant 0 : i32
    %c0_i32_0 = arith.constant 0 : i32
    return %c0_i32, %arg1 : i32, i32
  }
  func.func @transform_2(%arg0: i32, %arg1: i32) -> (i32, i32) {
    %c0_i32 = arith.constant 0 : i32
    %c0_i32_0 = arith.constant 0 : i32
    return %c0_i32, %arg1 : i32, i32
  }
  func.func @transform_3(%arg0: i32, %arg1: i32) -> (i32, i32) {
    %c0_i32 = arith.constant 0 : i32
    %c0_i32_0 = arith.constant 0 : i32
    return %arg1, %c0_i32 : i32, i32
  }
  func.func @transform_4(%arg0: i32, %arg1: i32) -> (i32, i32) {
    %c0_i32 = arith.constant 0 : i32
    %c0_i32_0 = arith.constant 0 : i32
    %c0_i32_1 = arith.constant 0 : i32
    return %c0_i32, %c0_i32_0 : i32, i32
  }
  func.func @transform_5(%arg0: i32, %arg1: i32) -> (i32, i32) {
    %c0_i32 = arith.constant 0 : i32
    %c0_i32_0 = arith.constant 0 : i32
    %c0_i32_1 = arith.constant 0 : i32
    return %c0_i32, %c0_i32_0 : i32, i32
  }
  func.func @transform_6(%arg0: i32, %arg1: i32) -> (i32, i32) {
    %c0_i32 = arith.constant 0 : i32
    %c0_i32_0 = arith.constant 0 : i32
    %c0_i32_1 = arith.constant 0 : i32
    return %c0_i32, %c0_i32_0 : i32, i32
  }
  func.func @transform_7(%arg0: i32, %arg1: i32) -> (i32, i32) {
    %c0_i32 = arith.constant 0 : i32
    %c0_i32_0 = arith.constant 0 : i32
    return %arg0, %c0_i32 : i32, i32
  }
}

</mosaic_0001>

<bundles_post_ra>
// kernel: _ffn_impl.1
= control target key start
LH: loop header
LB: loop body
LE: loop exit
PB: predicated region body
PF: predicated region fallthrough
CT: control target
= control target key end

     0   :  { %s1323_s0 = inlined_call_operand.hbm [shape: f32[16,128], index: 0, kind: input, shape index: {}]   ;;  %s1324_s1 = inlined_call_operand.hbm [shape: f32[128,256], index: 1, kind: input, shape index: {}]   ;;  %s1325_s2 = inlined_call_operand.vmem [shape: f32[1,256], index: 2, kind: input, shape index: {}]   ;;  %s1326_s3 = inlined_call_operand.hbm [shape: f32[256,128], index: 3, kind: input, shape index: {}]   ;;  %s1327_s4 = inlined_call_operand.vmem [shape: f32[1,128], index: 4, kind: input, shape index: {}]   ;;  %s1328_s5 = inlined_call_operand.vmem [shape: f32[1,128], index: 5, kind: input, shape index: {}]   ;;  %s1329_s6 = inlined_call_operand.vmem [shape: f32[1,128], index: 6, kind: input, shape index: {}]   ;;  %s1330_s7 = inlined_call_operand.hbm [shape: f32[16,128], index: 7, kind: output, shape index: {}]  }
   0x1   :  { %1335 = sst [smem:[#allocation14_spill]] %s1324_s1 }
   0x2   :  { %1336 = sst [smem:[#allocation15_spill]] %s1326_s3 }
   0x3   :  { %12 = vsyncpa [#allocation4], 0 }
   0x4   :  { %14 = vsyncpa [#allocation4 + $0x1], 0 }
   0x5   :  { %15 = vsyncpa [#allocation7], 0 }
   0x6   :  { %16 = vsyncpa [#allocation5], 0 }
   0x7   :  { %18 = vsyncpa [#allocation5 + $0x1], 0  ;;  %s1130_s24 = smov 0   ;;  %s1132_s25 = smov 0  }
   0x8   :  { %s1134_s26 = smov 0   ;;  %s1136_s27 = smov 0  }
   0x9   :  { %s1138_s28 = smov 0   ;;  %s1140_s29 = smov 0  }
   0xa LB: > { %s769_s30 = sadd.s32 4294967295, %s1079_s29   ;;  %s770_s8 = sadd.s32 4294967294, %s1079_s29   ;;  %s1079_s29 = sphi %s1140_s29, %s24_s29   ;;  %s1075_s28 = sphi %s1138_s28, %s1357_s28   ;;  %s1071_s27 = sphi %s1136_s27, %s1356_s27   ;;  %s1067_s26 = sphi %s1134_s26, %s1355_s26   ;;  %s1063_s25 = sphi %s1132_s25, %s1354_s25   ;;  %s1059_s24 = sphi %s1130_s24, %s1353_s24  }
   0xb   : > { %p56_p0 = scmp.ne.s32.totalorder %s1063_s25, %s1059_s24  ;;  %p1164_p1 = scmp.eq.s32.totalorder %s769_s30, 0 }
   0xc   : > { %p1168_p2 = scmp.eq.s32.totalorder %s769_s30, 1  ;;  %p227_p3 = scmp.eq.s32.totalorder %s770_s8, 1 }
   0xd   : > { %s1337_s9 = scalar_select %p1164_p1, 1, 0 }
   0xe   : > { %p1174_p4 = por %p1164_p1, %p56_p0  ;;  %p771_p5 = scmp.ge.s32.totalorder %s1079_s29, 1 }
   0xf   : > { %p1179_p6 = por %p227_p3, %p56_p0  ;;  %p234_p7 = scmp.lt.s32.totalorder %s1079_s29, 3 }
  0x10   : > { %s1339_s11 = scalar_select %p1174_p4, 1, 0 }
  0x11   : > { %s1340_s12 = scalar_select %p1179_p6, 1, 0 }
  0x12   : > { %p1184_p8 = pnand %p771_p5, %p234_p7  ;;  %s1081_s14 = smov [#allocation6]  }
  0x13   : > { %s249_s15 = sshll.u32 %s1081_s14, 4  ;;  %s1082_s17 = smov [#allocation8]   ;;  %s250_s15 = int_to_ptr.vmem [resolvable:$true] %s249_s15 }
  0x14   : > { %p837_p9 = pneg %p1184_p8  ;;  %s273_s18 = sshll.u32 %s1082_s17, 4  ;;  %s274_s18 = int_to_ptr.vmem [resolvable:$true] %s273_s18 }
  0x15   : > { %s926_s19 = scalar_lea.vmem %s250_s15, 4096  ;;  %p934_p5 = scmp.lt.s32.totalorder %s250_s15, %s250_s15 }
  0x16   : > { %p1193_p11 = pnand %p837_p9, %p1164_p1  ;;  %p927_p13 = scmp.ne.s32.totalorder %s250_s15, %s926_s19 }
  0x17   : > { %p935_p7 = scmp.lt.s32.totalorder %s926_s19, %s926_s19 }
  0x18   : > { %p917_p12 = pneg %p1193_p11 }
  0x19   : > { %p936_p10 = por %p935_p7, %p934_p5 }
  0x1a   : > { %p929_p0 = pnand %p927_p13, %p917_p12 }
  0x1c   : > { %p930_p3 = pneg %p929_p0 }
  0x1e   : > { %p937_p9 = pnand %p936_p10, %p930_p3 }
  0x20   : > { %940 = shalt.err (!%p937_p9)
}
  0x21   : > { %s1083_s20 = smov 256   ;;  %s1084_s21 = smov 16  }
  0x22   : > { %s1343_s1 = sld [smem:[#allocation14_spill]]  ;;  %s952_s30 = scalar_lea.vmem %s274_s18, 4096 }
  0x23   : > { %p953_p6 = scmp.ne.s32.totalorder %s274_s18, %s952_s30  ;;  %p960_p1 = scmp.lt.s32.totalorder %s274_s18, %s274_s18 }
  0x24   : > { %p961_p4 = scmp.lt.s32.totalorder %s952_s30, %s952_s30 }
  0x25   : > { %p955_p13 = pnand %p953_p6, %p917_p12 }
  0x26   : > { %p962_p5 = por %p961_p4, %p960_p1 }
  0x27   : > { %p956_p0 = pneg %p955_p13 }
  0x28   : > { %840 = dma.hbm_to_vmem [thread:$0]  (!%p1193_p11), %s1343_s1, 4096, %s250_s15, [#allocation7], %s1083_s20, %s1083_s20, %s1084_s21  }
  0x29   : > { %p963_p10 = pnand %p962_p5, %p956_p0 }
  0x2b   : > { %966 = shalt.err (!%p963_p10)
}
  0x2c   : > { %s1085_s8 = smov 128   ;;  %s1086_s14 = smov 8  }
  0x2d   : > { %s1344_s3 = sld [smem:[#allocation15_spill]]  ;;  %s36_s19 = sadd.s32 1, %s1075_s28 }
  0x2e   : > { %s43_s20 = sadd.s32 1, %s1067_s26  ;;  %p38_p1 = scmp.ge.s32.totalorder %s36_s19, 2 }
  0x2f   : > { %p50_p4 = scmp.ne.s32.totalorder %s1067_s26, %s1063_s25  ;;  %p51_p6 = scmp.eq.s32.totalorder %s1079_s29, 0 }
  0x30   : > { %p854_p12 = scmp.lt.s32.totalorder %s1079_s29, 2  ;;  %s1359_s19 = smov (%p38_p1, %s36_s19), 0 }
  0x31   : > { %1345 = sst [smem:[#allocation13_spill]] %s1359_s19  ;;  %p52_p3 = por %p51_p6, %p50_p4 }
  0x32   : > { %p1225_p7 = por %p1168_p2, %p50_p4  ;;  %s40_s16 = ssub.s32 %s1075_s28, %s1359_s19 }
  0x33   : > { %843 = dma.hbm_to_vmem [thread:$0]  (!%p1193_p11), %s1344_s3, 4096, %s274_s18, [#allocation7], %s1085_s8, %s1085_s8, %s1086_s14  }
  0x34   : > { %s296_s22 = sand.u32 1, %s1067_s26   ;;  %p41_p9 = scmp.eq.s32.totalorder %s40_s16, 0 }
  0x35   : > { %s776_s18 = sshll.u32 %s296_s22, 3  ;;  %s777_s23 = sshll.u32 %s1075_s28, 7 }
  0x36   : > { %s1234_s30 = scalar_select %p41_p9, %s1067_s26, %s43_s20  }
  0x37   : > { %s305_s15 = scalar_lea.hbm %s1323_s0, %s777_s23  ;;  %s300_s17 = scalar_lea.vmem [#allocation3], %s776_s18 }
  0x38   : > { %s307_s1 = sshll.u32 %s300_s17, 4  ;;  %p1241_p11 = pnand %p854_p12, %p52_p3  ;;  %s308_s1 = int_to_ptr.vmem [resolvable:$true] %s307_s1 }
  0x39   : > { %s297_s3 = scalar_lea.sflag [#allocation4], %s296_s22  ;;  %s980_s16 = scalar_lea.vmem %s308_s1, 128 }
  0x3a   : > { %p969_p2 = pneg %p1241_p11  ;;  %p981_p13 = scmp.ne.s32.totalorder %s308_s1, %s980_s16 }
  0x3b   : > { %s1087_s20 = smov [#allocation3]  }
  0x3c   : > { %p983_p0 = pnand %p981_p13, %p969_p2  ;;  %s985_s19 = sshll.u32 %s1087_s20, 4  ;;  %s986_s19 = int_to_ptr.vmem [resolvable:$false] %s985_s19 }
  0x3d   : > { %s987_s23 = scalar_lea.vmem %s986_s19, 256  ;;  %p988_p10 = scmp.lt.s32.totalorder %s308_s1, %s986_s19 }
  0x3e   : > { %p984_p5 = pneg %p983_p0  ;;  %p989_p1 = scmp.lt.s32.totalorder %s987_s23, %s980_s16 }
  0x40   : > { %p990_p4 = por %p989_p1, %p988_p10 }
  0x42   : > { %p991_p6 = pnand %p990_p4, %p984_p5 }
  0x44   : > { %994 = shalt.err (!%p991_p6)
}
  0x45   : > { %847 = dma.hbm_to_vmem [thread:$0]  (!%p1241_p11), %s305_s15, 128, %s308_s1, %s297_s3  }
  0x46   : > { %316 = sbr.rel (%p1184_p8) target bundleno = 832 (0x340), region = 48  ;;  %s1252_s22 = sand.u32 (!%p1184_p8), 1, %s1063_s25  }
  0x47   : > { %s779_s18 = sshll.u32 (!%p1184_p8), %s1252_s22, 3  ;;  %s319_s8 = scalar_lea.sflag (!%p1184_p8), [#allocation4], %s1252_s22 }
  0x48   : > { %s1258_s19 = scalar_lea.vmem (!%p1184_p8), [#allocation3], %s779_s18  ;;  %p1348_p12 = scmp.ne.s32.totalorder (!%p1184_p8), %s1339_s11, 0 }
  0x4b   : > { %1046 = dma.done.wait (%p1348_p12), %s319_s8, 128  }
  0x4c   : > { %1048 = vsyncadd (%p1348_p12), %s319_s8, 4294967168  ;;  %p1349_p3 = scmp.ne.s32.totalorder %s1337_s9, 0 }
  0x4e   : > { %1050 = dma.done.wait (%p1349_p3), [#allocation7], 8192  }
  0x4f   : > { %1052 = vsyncadd (%p1349_p3), [#allocation7], 4294959104  ;;  %v1088_v0 = vmov 0.0   ;;  %v409_v1 = vld [vmem:[#allocation6 + $0xf8] sm:$0xff]  ;;  %v408_v2 = vld [vmem:[#allocation6 + $0xf0] sm:$0xff]  ;;  %s787_s10 = sshll.u32 %s1071_s27, 7 }
  0x50   : > { %486 = vmatprep.mubr.f32.mxu0 %v1088_v0  ;;  %v407_v3 = vld [vmem:[#allocation6 + $0xe8] sm:$0xff]  ;;  %422 = vmatprep.subr.mxu0 %v409_v1  ;;  %v406_v4 = vld [vmem:[#allocation6 + $0xe0] sm:$0xff]  ;;  %v405_v5 = vld [vmem:[#allocation6 + $0xd8] sm:$0xff]  ;;  %s364_s16 = scalar_lea.vmem [#allocation9], %s779_s18  ;;  %s643_s1 = scalar_lea.sflag [#allocation5], %s1252_s22 }
  0x51   : > { %423 = vmatpush1.msra.mxu0 %v408_v2  ;;  %v404_v6 = vld [vmem:[#allocation6 + $0xd0] sm:$0xff]  ;;  %v403_v7 = vld [vmem:[#allocation6 + $0xc8] sm:$0xff]  ;;  %v402_v8 = vld [vmem:[#allocation6 + $0xc0] sm:$0xff]  ;;  %v412_v2 = vlaneseq  ;;  %s656_s20 = sshll.u32 %s364_s16, 4  ;;  %s1089_s9 = smov [#allocation9]   ;;  %s657_s20 = int_to_ptr.vmem [resolvable:$true] %s656_s20 }
  0x52   : > { %424 = vmatprep.subr.mxu0 %v407_v3  ;;  %v401_v9 = vld [vmem:[#allocation6 + $0xb8] sm:$0xff]  ;;  %v400_v10 = vld [vmem:[#allocation6 + $0xb0] sm:$0xff]  ;;  %v399_v11 = vld [vmem:[#allocation6 + $0xa8] sm:$0xff]  ;;  %s995_s3 = scalar_lea.vmem %s657_s20, 128  ;;  %s999_s11 = sshll.u32 %s1089_s9, 4  ;;  %s1000_s11 = int_to_ptr.vmem [resolvable:$false] %s999_s11 }
  0x53   : > { %425 = vmatpush1.msra.mxu0 %v406_v4  ;;  %v398_v12 = vld [vmem:[#allocation6 + $0xa0] sm:$0xff]  ;;  %v397_v13 = vld [vmem:[#allocation6 + $0x98] sm:$0xff]  ;;  %v396_v14 = vld [vmem:[#allocation6 + $0x90] sm:$0xff]  ;;  %v413_v3 = vshrl.u32 %v412_v2, 7  ;;  %p996_p8 = scmp.ne.s32.totalorder %s657_s20, %s995_s3  ;;  %s1001_s27 = scalar_lea.vmem %s1000_s11, 256 }
  0x54   : > { %426 = vmatprep.subr.mxu0 %v405_v5  ;;  %v527_v15 = vld [vmem:[#allocation8 + $0xf8] sm:$0xff]  ;;  %v526_v17 = vld [vmem:[#allocation8 + $0xf0] sm:$0xff]  ;;  %v395_v18 = vld [vmem:[#allocation6 + $0x88] sm:$0xff]  ;;  %p1002_p2 = scmp.lt.s32.totalorder %s657_s20, %s1000_s11  ;;  %p1003_p13 = scmp.lt.s32.totalorder %s1001_s27, %s995_s3 }
  0x55   : > { %427 = vmatpush1.msra.mxu0 %v404_v6  ;;  %v511_v16 = vld [vmem:[#allocation8 + $0x78] sm:$0xff]  ;;  %790 = vmatprep.subr.mxu1 %v527_v15  ;;  %v510_v19 = vld [vmem:[#allocation8 + $0x70] sm:$0xff]  ;;  %v394_v20 = vld [vmem:[#allocation6 + $0x80] sm:$0xff]  ;;  %v414_v4 = vsub.s32 0, %v413_v3  ;;  %v418_v6 = vsub.s32 1, %v413_v3  ;;  %p997_p9 = pnand %p996_p8, %p1225_p7 }
  0x56   : > { %428 = vmatprep.subr.mxu0 %v403_v7  ;;  %791 = vmatpush3.msra.mxu1 %v511_v16  ;;  %v525_v21 = vld [vmem:[#allocation8 + $0xe8] sm:$0xff]  ;;  %v393_v22 = vld [vmem:[#allocation6 + $0x78] sm:$0xff]  ;;  %v392_v24 = vld [vmem:[#allocation6 + $0x70] sm:$0xff]  ;;  %p1004_p0 = por %p1003_p13, %p1002_p2 }
  0x57   : > { %429 = vmatpush1.msra.mxu0 %v402_v8  ;;  %792 = vmatprep.subr.mxu1 %v526_v17  ;;  %v509_v23 = vld [vmem:[#allocation8 + $0x68] sm:$0xff]  ;;  %v524_v25 = vld [vmem:[#allocation8 + $0xe0] sm:$0xff]  ;;  %v523_v29 = vld [vmem:[#allocation8 + $0xd8] sm:$0xff]  ;;  %p998_p11 = pneg %p997_p9 }
  0x58   : > { %430 = vmatprep.subr.mxu0 %v401_v9  ;;  %793 = vmatpush3.msra.mxu1 %v510_v19  ;;  %v391_v26 = vld [vmem:[#allocation6 + $0x68] sm:$0xff]  ;;  %v508_v27 = vld [vmem:[#allocation8 + $0x60] sm:$0xff]  ;;  %v389_v30 = vld [vmem:[#allocation6 + $0x58] sm:$0xff] }
  0x59   : > { %431 = vmatpush1.msra.mxu0 %v400_v10  ;;  %794 = vmatprep.subr.mxu1 %v525_v21  ;;  %v390_v28 = vld [vmem:[#allocation6 + $0x60] sm:$0xff]  ;;  %v507_v31 = vld [vmem:[#allocation8 + $0x58] sm:$0xff]  ;;  %v388_v32 = vld [vmem:[#allocation6 + $0x50] sm:$0xff]  ;;  %p1005_p5 = pnand %p1004_p0, %p998_p11 }
  0x5a   : > { %432 = vmatprep.subr.mxu0 %v399_v11  ;;  %795 = vmatpush3.msra.mxu1 %v509_v23  ;;  %v522_v33 = vld [vmem:[#allocation8 + $0xd0] sm:$0xff]  ;;  %v387_v34 = vld [vmem:[#allocation6 + $0x48] sm:$0xff]  ;;  %v386_v36 = vld [vmem:[#allocation6 + $0x40] sm:$0xff] }
  0x5b   : > { %433 = vmatpush1.msra.mxu0 %v398_v12  ;;  %796 = vmatprep.subr.mxu1 %v524_v25  ;;  %v506_v35 = vld [vmem:[#allocation8 + $0x50] sm:$0xff]  ;;  %v521_v37 = vld [vmem:[#allocation8 + $0xc8] sm:$0xff]  ;;  %v385_v38 = vld [vmem:[#allocation6 + $0x38] sm:$0xff] }
  0x5c   : > { %434 = vmatprep.subr.mxu0 %v397_v13  ;;  %797 = vmatpush3.msra.mxu1 %v508_v27  ;;  %v505_v39 = vld [vmem:[#allocation8 + $0x48] sm:$0xff]  ;;  %v384_v40 = vld [vmem:[#allocation6 + $0x30] sm:$0xff]  ;;  %v520_v41 = vld [vmem:[#allocation8 + $0xc0] sm:$0xff] }
  0x5d   : > { %435 = vmatpush1.msra.mxu0 %v396_v14  ;;  %798 = vmatprep.subr.mxu1 %v523_v29  ;;  %v383_v42 = vld [vmem:[#allocation6 + $0x28] sm:$0xff]  ;;  %v504_v43 = vld [vmem:[#allocation8 + $0x40] sm:$0xff]  ;;  %v519_v45 = vld [vmem:[#allocation8 + $0xb8] sm:$0xff] }
  0x5e   : > { %436 = vmatprep.subr.mxu0 %v395_v18  ;;  %799 = vmatpush3.msra.mxu1 %v507_v31  ;;  %v382_v44 = vld [vmem:[#allocation6 + $0x20] sm:$0xff]  ;;  %v381_v46 = vld [vmem:[#allocation6 + $0x18] sm:$0xff]  ;;  %v380_v48 = vld [vmem:[#allocation6 + $0x10] sm:$0xff] }
  0x5f   : > { %437 = vmatpush1.msra.mxu0 %v394_v20  ;;  %800 = vmatprep.subr.mxu1 %v522_v33  ;;  %v503_v47 = vld [vmem:[#allocation8 + $0x38] sm:$0xff]  ;;  %v518_v49 = vld [vmem:[#allocation8 + $0xb0] sm:$0xff]  ;;  %v379_v50 = vld [vmem:[#allocation6 + $0x8] sm:$0xff] }
  0x60   : > { %438 = vmatprep.subr.mxu0 %v393_v22  ;;  %801 = vmatpush3.msra.mxu1 %v506_v35  ;;  %v502_v51 = vld [vmem:[#allocation8 + $0x30] sm:$0xff]  ;;  %v378_v52 = vld [vmem:[#allocation6] sm:$0xff]  ;;  %v517_v53 = vld [vmem:[#allocation8 + $0xa8] sm:$0xff] }
  0x61   : > { %439 = vmatpush1.msra.mxu0 %v392_v24  ;;  %802 = vmatprep.subr.mxu1 %v521_v37  ;;  %v377_v54 = vld [vmem:[%s1258_s19] sm:$0xff]  ;;  %v501_v55 = vld [vmem:[#allocation8 + $0x28] sm:$0xff]  ;;  %v516_v56 = vld [vmem:[#allocation8 + $0xa0] sm:$0xff]  ;;  %s654_s19 = scalar_lea.hbm %s1330_s7, %s787_s10 }
  0x62   : > { %440 = vmatprep.subr.mxu0 %v391_v26  ;;  %803 = vmatpush3.msra.mxu1 %v505_v39  ;;  %v500_v57 = vld [vmem:[#allocation8 + $0x20] sm:$0xff]  ;;  %v515_v58 = vld [vmem:[#allocation8 + $0x98] sm:$0xff]  ;;  %v514_v60 = vld [vmem:[#allocation8 + $0x90] sm:$0xff] }
  0x63   : > { %441 = vmatpush1.msra.mxu0 %v390_v28  ;;  %804 = vmatprep.subr.mxu1 %v520_v41  ;;  %v499_v59 = vld [vmem:[#allocation8 + $0x18] sm:$0xff]  ;;  %v498_v61 = vld [vmem:[#allocation8 + $0x10] sm:$0xff]  ;;  %v513_v62 = vld [vmem:[#allocation8 + $0x88] sm:$0xff] }
  0x64   : > { %442 = vmatprep.subr.mxu0 %v389_v30  ;;  %805 = vmatpush3.msra.mxu1 %v504_v43  ;;  %v497_v63 = vld [vmem:[#allocation8 + $0x8] sm:$0xff]  ;;  %v512_v0 = vld [vmem:[#allocation8 + $0x80] sm:$0xff]  ;;  %v410_v5 = vld [vmem:[%s1325_s2] sm:$0x3] }
  0x65   : > { %443 = vmatpush1.msra.mxu0 %v388_v32  ;;  %806 = vmatprep.subr.mxu1 %v519_v45  ;;  %v496_v1 = vld [vmem:[#allocation8] sm:$0xff]  ;;  %v415_v7 = vrot.slane %v410_v5, %v414_v4  ;;  %v419_v8 = vrot.slane %v410_v5, %v418_v6  ;;  %v783_v18 = vld [vmem:[%s1327_s4] ss:$0 sm:$0xff] }
  0x66   : > { %444 = vmatprep.subr.mxu0 %v387_v34  ;;  %807 = vmatpush3.msra.mxu1 %v503_v47  ;;  %v784_v29 = vld [vmem:[%s1328_s5] ss:$0 sm:$0xff] }
  0x67   : > { %445 = vmatpush1.msra.mxu0 %v386_v36  ;;  %808 = vmatprep.subr.mxu1 %v518_v49  ;;  %v785_v31 = vld [vmem:[%s1329_s6] ss:$0 sm:$0xff] }
  0x68   : > { %446 = vmatprep.subr.mxu0 %v385_v38  ;;  %809 = vmatpush3.msra.mxu1 %v502_v51 }
  0x69   : > { %447 = vmatpush1.msra.mxu0 %v384_v40  ;;  %810 = vmatprep.subr.mxu1 %v517_v53 }
  0x6a   : > { %448 = vmatprep.subr.mxu0 %v383_v42  ;;  %811 = vmatpush3.msra.mxu1 %v501_v55 }
  0x6b   : > { %449 = vmatpush1.msra.mxu0 %v382_v44  ;;  %812 = vmatprep.subr.mxu1 %v516_v56 }
  0x6c   : > { %450 = vmatprep.subr.mxu0 %v381_v46  ;;  %813 = vmatpush3.msra.mxu1 %v500_v57 }
  0x6d   : > { %451 = vmatpush1.msra.mxu0 %v380_v48  ;;  %814 = vmatprep.subr.mxu1 %v515_v58 }
  0x6e   : > { %452 = vmatprep.subr.mxu0 %v379_v50  ;;  %815 = vmatpush3.msra.mxu1 %v499_v59 }
  0x6f   : > { %453 = vmatpush1.msra.mxu0 %v378_v52  ;;  %816 = vmatprep.subr.mxu1 %v514_v60 }
  0x70   : > { %487 = vmatmul.mubr.f32.vlgmr.msra.gmra.mxu0 %v377_v54  ;;  %817 = vmatpush3.msra.mxu1 %v498_v61 }
  0x71   : > { %818 = vmatprep.subr.mxu1 %v513_v62 }
  0x72   : > { %819 = vmatpush3.msra.mxu1 %v497_v63 }
  0x73   : > { %820 = vmatprep.subr.mxu1 %v512_v0 }
  0x74   : > { %821 = vmatpush3.msra.mxu1 %v496_v1 }
 0x130   : > { %v488_v9 = vpop.f32.mrf.mxu0 }
 0x131   : > { %v489_v10 = vadd.f32 %v488_v9, %v415_v7 }
 0x132   : > { %v490_v11 = vpop.f32.mrf.mxu0 }
 0x133   : > { %v491_v12 = vadd.f32 %v490_v11, %v419_v8  ;;  %v493_v14 = vmax.f32 %v489_v10, 0.0 }
 0x135   : > { %v494_v13 = vmax.f32 %v491_v12, 0.0 }
 0x137   : > { %592 = vmatprep.mubr.f32.mxu1 %v494_v13 }
 0x138   : > { %593 = vmatmul.mubr.f32.vlgmr.msra.gmra.mxu1 %v493_v14 }
 0x1f8   : > { %v822_v15 = vpop.f32.mrf.mxu1 }
 0x1fa   : > { %v823_v16 = vpop.f32.mrf.mxu1 }
 0x1fb   : > { %v824_v17 = vadd.f32 %v823_v16, %v822_v15 }
 0x1fd   : > { %v604_v19 = vadd.f32 %v824_v17, %v377_v54 }
 0x1ff   : > { %v612_v20 = vadd.f32 %v783_v18, %v604_v19 }
 0x201   : > { %613 = vadd.xlane.f32.xlu0 %v612_v20 }
 0x28a   : > { %v614_v21 = vpop.xlane.xlu0 %613 }
 0x28b   : > { %v616_v22 = vmul.f32 0.0078125, %v614_v21 }
 0x28d   : > { %v617_v23 = vsub.f32 %v612_v20, %v616_v22 }
 0x28f   : > { %v618_v24 = vmul.f32 %v617_v23, %v617_v23 }
 0x291   : > { %619 = vadd.xlane.f32.xlu0 %v618_v24 }
 0x31a   : > { %v620_v25 = vpop.xlane.xlu0 %619 }
 0x31b   : > { %v621_v26 = vmul.f32 0.0078125, %v620_v25 }
 0x31d   : > { %v622_v27 = vadd.f32 1e-05, %v621_v26 }
 0x31f   : > { %913 = vrsqrt.f32 %v622_v27 }
 0x32c   : > { %v914_v28 = vpop.eup %913 }
 0x32d   : > { %v624_v30 = vmul.f32 %v914_v28, %v617_v23 }
 0x32f   : > { %v632_v32 = vmul.f32 %v784_v29, %v624_v30 }
 0x331   : > { %v640_v33 = vadd.f32 %v785_v31, %v632_v32 }
 0x333   : > { %641 = vst [vmem:[%s364_s16] sm:$0xff] %v640_v33 }
 0x334   : > { %1008 = shalt.err (!%p1005_p5)
}
 0x335   : > { %s1009_s18 = scalar_lea.hbm %s654_s19, 128  ;;  %s1013_s14 = scalar_lea.hbm %s1330_s7, 256 }
 0x336   : > { %p1010_p10 = scmp.ne.s32.totalorder %s654_s19, %s1009_s18  ;;  %p1014_p6 = scmp.lt.s32.totalorder %s654_s19, %s1330_s7 }
 0x337   : > { %p1015_p12 = scmp.lt.s32.totalorder %s1013_s14, %s1009_s18 }
 0x338   : > { %p1011_p1 = pnand %p1010_p10, %p1225_p7 }
 0x339   : > { %p1016_p3 = por %p1015_p12, %p1014_p6 }
 0x33a   : > { %p1012_p4 = pneg %p1011_p1 }
 0x33c   : > { %p1017_p8 = pnand %p1016_p3, %p1012_p4 }
 0x33e   : > { %1020 = shalt.err (!%p1017_p8)
}
 0x33f   : > { %835 = dma.vmem_to_hbm [thread:$0]  (%p1225_p7), %s657_s20, 128, %s654_s19, %s643_s1  }
 0x340 PF: > { %s668_s10 = sand.u32 1, %s1059_s24   ;;  %p1350_p9 = scmp.ne.s32.totalorder %s1340_s12, 0 }
 0x341   : > { %p1351_p11 = scmp.ge.s32.totalorder %s1079_s29, 2  ;;  %s669_s16 = scalar_lea.sflag [#allocation5], %s668_s10 }
 0x343   : > { %p849_p2 = pnand %p1351_p11, %p1350_p9 }
 0x345   : > { %p850_p13 = pneg %p849_p2 }
 0x347   : > { %1054 = dma.done.wait (%p850_p13), %s669_s16, 128  }
 0x348   : > { %1056 = vsyncadd (%p850_p13), %s669_s16, 4294967168  ;;  %s24_s29 = sadd.s32 1, %s1079_s29   ;;  %s1352_s21 = sld [smem:[#allocation13_spill]] }
 0x349   : > { %p21_p0 = scmp.ge.s32.totalorder %s24_s29, 4   ;;  %s1353_s24 = smov %s1063_s25 }
 0x34a   : > { %s1354_s25 = smov %s1067_s26  ;;  %s1355_s26 = smov %s1234_s30 }
 0x34b   : > { %s1356_s27 = smov %s1075_s28  ;;  %23 = sbr.rel (!%p21_p0) target bundleno = 10 (0xa), region = 114 }
 0x34e   : > { %s1357_s28 = smov %s1352_s21 }
 0x350   :  { %674 = vsyncpa [#allocation4], 1 }
 0x351   :  { %676 = vsyncpa [#allocation4 + $0x1], 1 }
 0x352   :  { %677 = vsyncpa [#allocation7], 1 }
 0x353   :  { %678 = vsyncpa [#allocation5], 1 }
 0x354   :  { %680 = vsyncpa [#allocation5 + $0x1], 1 }

// kernel: _ffn_impl.1
= control target key start
LH: loop header
LB: loop body
LE: loop exit
PB: predicated region body
PF: predicated region fallthrough
CT: control target
= control target key end

     0   :  { %s1323_s0 = inlined_call_operand.hbm [shape: f32[16,128], index: 0, kind: input, shape index: {}]   ;;  %s1324_s1 = inlined_call_operand.hbm [shape: f32[128,256], index: 1, kind: input, shape index: {}]   ;;  %s1325_s2 = inlined_call_operand.vmem [shape: f32[1,256], index: 2, kind: input, shape index: {}]   ;;  %s1326_s3 = inlined_call_operand.hbm [shape: f32[256,128], index: 3, kind: input, shape index: {}]   ;;  %s1327_s4 = inlined_call_operand.vmem [shape: f32[1,128], index: 4, kind: input, shape index: {}]   ;;  %s1328_s5 = inlined_call_operand.vmem [shape: f32[1,128], index: 5, kind: input, shape index: {}]   ;;  %s1329_s6 = inlined_call_operand.vmem [shape: f32[1,128], index: 6, kind: input, shape index: {}]   ;;  %s1330_s7 = inlined_call_operand.hbm [shape: f32[16,128], index: 7, kind: output, shape index: {}]  }
   0x1   :  { %1335 = sst [smem:[#allocation14_spill]] %s1324_s1 }
   0x2   :  { %1336 = sst [smem:[#allocation15_spill]] %s1326_s3 }
   0x3   :  { %12 = vsyncpa [#allocation4], 0 }
   0x4   :  { %14 = vsyncpa [#allocation4 + $0x1], 0 }
   0x5   :  { %15 = vsyncpa [#allocation7], 0 }
   0x6   :  { %16 = vsyncpa [#allocation5], 0 }
   0x7   :  { %18 = vsyncpa [#allocation5 + $0x1], 0  ;;  %s1130_s24 = smov 0   ;;  %s1132_s25 = smov 0  }
   0x8   :  { %s1134_s26 = smov 0   ;;  %s1136_s27 = smov 0  }
   0x9   :  { %s1138_s28 = smov 0   ;;  %s1140_s29 = smov 0  }
   0xa LB: > { %s769_s30 = sadd.s32 4294967295, %s1079_s29   ;;  %s770_s8 = sadd.s32 4294967294, %s1079_s29   ;;  %s1079_s29 = sphi %s1140_s29, %s24_s29   ;;  %s1075_s28 = sphi %s1138_s28, %s1357_s28   ;;  %s1071_s27 = sphi %s1136_s27, %s1356_s27   ;;  %s1067_s26 = sphi %s1134_s26, %s1355_s26   ;;  %s1063_s25 = sphi %s1132_s25, %s1354_s25   ;;  %s1059_s24 = sphi %s1130_s24, %s1353_s24  }
   0xb   : > { %p56_p0 = scmp.ne.s32.totalorder %s1063_s25, %s1059_s24  ;;  %p1164_p1 = scmp.eq.s32.totalorder %s769_s30, 0 }
   0xc   : > { %p1168_p2 = scmp.eq.s32.totalorder %s769_s30, 1  ;;  %p227_p3 = scmp.eq.s32.totalorder %s770_s8, 1 }
   0xd   : > { %s1337_s9 = scalar_select %p1164_p1, 1, 0 }
   0xe   : > { %p1174_p4 = por %p1164_p1, %p56_p0  ;;  %p771_p5 = scmp.ge.s32.totalorder %s1079_s29, 1 }
   0xf   : > { %p1179_p6 = por %p227_p3, %p56_p0  ;;  %p234_p7 = scmp.lt.s32.totalorder %s1079_s29, 3 }
  0x10   : > { %s1339_s11 = scalar_select %p1174_p4, 1, 0 }
  0x11   : > { %s1340_s12 = scalar_select %p1179_p6, 1, 0 }
  0x12   : > { %p1184_p8 = pnand %p771_p5, %p234_p7  ;;  %s1081_s14 = smov [#allocation6]  }
  0x13   : > { %s249_s15 = sshll.u32 %s1081_s14, 4  ;;  %s1082_s17 = smov [#allocation8]   ;;  %s250_s15 = int_to_ptr.vmem [resolvable:$true] %s249_s15 }
  0x14   : > { %p837_p9 = pneg %p1184_p8  ;;  %s273_s18 = sshll.u32 %s1082_s17, 4  ;;  %s274_s18 = int_to_ptr.vmem [resolvable:$true] %s273_s18 }
  0x15   : > { %s926_s19 = scalar_lea.vmem %s250_s15, 4096  ;;  %p934_p5 = scmp.lt.s32.totalorder %s250_s15, %s250_s15 }
  0x16   : > { %p1193_p11 = pnand %p837_p9, %p1164_p1  ;;  %p927_p13 = scmp.ne.s32.totalorder %s250_s15, %s926_s19 }
  0x17   : > { %p935_p7 = scmp.lt.s32.totalorder %s926_s19, %s926_s19 }
  0x18   : > { %p917_p12 = pneg %p1193_p11 }
  0x19   : > { %p936_p10 = por %p935_p7, %p934_p5 }
  0x1a   : > { %p929_p0 = pnand %p927_p13, %p917_p12 }
  0x1c   : > { %p930_p3 = pneg %p929_p0 }
  0x1e   : > { %p937_p9 = pnand %p936_p10, %p930_p3 }
  0x20   : > { %940 = shalt.err (!%p937_p9)
}
  0x21   : > { %s1083_s20 = smov 256   ;;  %s1084_s21 = smov 16  }
  0x22   : > { %s1343_s1 = sld [smem:[#allocation14_spill]]  ;;  %s952_s30 = scalar_lea.vmem %s274_s18, 4096 }
  0x23   : > { %p953_p6 = scmp.ne.s32.totalorder %s274_s18, %s952_s30  ;;  %p960_p1 = scmp.lt.s32.totalorder %s274_s18, %s274_s18 }
  0x24   : > { %p961_p4 = scmp.lt.s32.totalorder %s952_s30, %s952_s30 }
  0x25   : > { %p955_p13 = pnand %p953_p6, %p917_p12 }
  0x26   : > { %p962_p5 = por %p961_p4, %p960_p1 }
  0x27   : > { %p956_p0 = pneg %p955_p13 }
  0x28   : > { %840 = dma.hbm_to_vmem [thread:$0]  (!%p1193_p11), %s1343_s1, 4096, %s250_s15, [#allocation7], %s1083_s20, %s1083_s20, %s1084_s21  }
  0x29   : > { %p963_p10 = pnand %p962_p5, %p956_p0 }
  0x2b   : > { %966 = shalt.err (!%p963_p10)
}
  0x2c   : > { %s1085_s8 = smov 128   ;;  %s1086_s14 = smov 8  }
  0x2d   : > { %s1344_s3 = sld [smem:[#allocation15_spill]]  ;;  %s36_s19 = sadd.s32 1, %s1075_s28 }
  0x2e   : > { %s43_s20 = sadd.s32 1, %s1067_s26  ;;  %p38_p1 = scmp.ge.s32.totalorder %s36_s19, 2 }
  0x2f   : > { %p50_p4 = scmp.ne.s32.totalorder %s1067_s26, %s1063_s25  ;;  %p51_p6 = scmp.eq.s32.totalorder %s1079_s29, 0 }
  0x30   : > { %p854_p12 = scmp.lt.s32.totalorder %s1079_s29, 2  ;;  %s1359_s19 = smov (%p38_p1, %s36_s19), 0 }
  0x31   : > { %1345 = sst [smem:[#allocation13_spill]] %s1359_s19  ;;  %p52_p3 = por %p51_p6, %p50_p4 }
  0x32   : > { %p1225_p7 = por %p1168_p2, %p50_p4  ;;  %s40_s16 = ssub.s32 %s1075_s28, %s1359_s19 }
  0x33   : > { %843 = dma.hbm_to_vmem [thread:$0]  (!%p1193_p11), %s1344_s3, 4096, %s274_s18, [#allocation7], %s1085_s8, %s1085_s8, %s1086_s14  }
  0x34   : > { %s296_s22 = sand.u32 1, %s1067_s26   ;;  %p41_p9 = scmp.eq.s32.totalorder %s40_s16, 0 }
  0x35   : > { %s776_s18 = sshll.u32 %s296_s22, 3  ;;  %s777_s23 = sshll.u32 %s1075_s28, 7 }
  0x36   : > { %s1234_s30 = scalar_select %p41_p9, %s1067_s26, %s43_s20  }
  0x37   : > { %s305_s15 = scalar_lea.hbm %s1323_s0, %s777_s23  ;;  %s300_s17 = scalar_lea.vmem [#allocation3], %s776_s18 }
  0x38   : > { %s307_s1 = sshll.u32 %s300_s17, 4  ;;  %p1241_p11 = pnand %p854_p12, %p52_p3  ;;  %s308_s1 = int_to_ptr.vmem [resolvable:$true] %s307_s1 }
  0x39   : > { %s297_s3 = scalar_lea.sflag [#allocation4], %s296_s22  ;;  %s980_s16 = scalar_lea.vmem %s308_s1, 128 }
  0x3a   : > { %p969_p2 = pneg %p1241_p11  ;;  %p981_p13 = scmp.ne.s32.totalorder %s308_s1, %s980_s16 }
  0x3b   : > { %s1087_s20 = smov [#allocation3]  }
  0x3c   : > { %p983_p0 = pnand %p981_p13, %p969_p2  ;;  %s985_s19 = sshll.u32 %s1087_s20, 4  ;;  %s986_s19 = int_to_ptr.vmem [resolvable:$false] %s985_s19 }
  0x3d   : > { %s987_s23 = scalar_lea.vmem %s986_s19, 256  ;;  %p988_p10 = scmp.lt.s32.totalorder %s308_s1, %s986_s19 }
  0x3e   : > { %p984_p5 = pneg %p983_p0  ;;  %p989_p1 = scmp.lt.s32.totalorder %s987_s23, %s980_s16 }
  0x40   : > { %p990_p4 = por %p989_p1, %p988_p10 }
  0x42   : > { %p991_p6 = pnand %p990_p4, %p984_p5 }
  0x44   : > { %994 = shalt.err (!%p991_p6)
}
  0x45   : > { %847 = dma.hbm_to_vmem [thread:$0]  (!%p1241_p11), %s305_s15, 128, %s308_s1, %s297_s3  }
  0x46   : > { %316 = sbr.rel (%p1184_p8) target bundleno = 832 (0x340), region = 48  ;;  %s1252_s22 = sand.u32 (!%p1184_p8), 1, %s1063_s25  }
  0x47   : > { %s779_s18 = sshll.u32 (!%p1184_p8), %s1252_s22, 3  ;;  %s319_s8 = scalar_lea.sflag (!%p1184_p8), [#allocation4], %s1252_s22 }
  0x48   : > { %s1258_s19 = scalar_lea.vmem (!%p1184_p8), [#allocation3], %s779_s18  ;;  %p1348_p12 = scmp.ne.s32.totalorder (!%p1184_p8), %s1339_s11, 0 }
  0x4b   : > { %1046 = dma.done.wait (%p1348_p12), %s319_s8, 128  }
  0x4c   : > { %1048 = vsyncadd (%p1348_p12), %s319_s8, 4294967168  ;;  %p1349_p3 = scmp.ne.s32.totalorder %s1337_s9, 0 }
  0x4e   : > { %1050 = dma.done.wait (%p1349_p3), [#allocation7], 8192  }
  0x4f   : > { %1052 = vsyncadd (%p1349_p3), [#allocation7], 4294959104  ;;  %v1088_v0 = vmov 0.0   ;;  %v409_v1 = vld [vmem:[#allocation6 + $0xf8] sm:$0xff]  ;;  %v408_v2 = vld [vmem:[#allocation6 + $0xf0] sm:$0xff]  ;;  %s787_s10 = sshll.u32 %s1071_s27, 7 }
  0x50   : > { %486 = vmatprep.mubr.f32.mxu0 %v1088_v0  ;;  %v407_v3 = vld [vmem:[#allocation6 + $0xe8] sm:$0xff]  ;;  %422 = vmatprep.subr.mxu0 %v409_v1  ;;  %v406_v4 = vld [vmem:[#allocation6 + $0xe0] sm:$0xff]  ;;  %v405_v5 = vld [vmem:[#allocation6 + $0xd8] sm:$0xff]  ;;  %s364_s16 = scalar_lea.vmem [#allocation9], %s779_s18  ;;  %s643_s1 = scalar_lea.sflag [#allocation5], %s1252_s22 }
  0x51   : > { %423 = vmatpush1.msra.mxu0 %v408_v2  ;;  %v404_v6 = vld [vmem:[#allocation6 + $0xd0] sm:$0xff]  ;;  %v403_v7 = vld [vmem:[#allocation6 + $0xc8] sm:$0xff]  ;;  %v402_v8 = vld [vmem:[#allocation6 + $0xc0] sm:$0xff]  ;;  %v412_v2 = vlaneseq  ;;  %s656_s20 = sshll.u32 %s364_s16, 4  ;;  %s1089_s9 = smov [#allocation9]   ;;  %s657_s20 = int_to_ptr.vmem [resolvable:$true] %s656_s20 }
  0x52   : > { %424 = vmatprep.subr.mxu0 %v407_v3  ;;  %v401_v9 = vld [vmem:[#allocation6 + $0xb8] sm:$0xff]  ;;  %v400_v10 = vld [vmem:[#allocation6 + $0xb0] sm:$0xff]  ;;  %v399_v11 = vld [vmem:[#allocation6 + $0xa8] sm:$0xff]  ;;  %s995_s3 = scalar_lea.vmem %s657_s20, 128  ;;  %s999_s11 = sshll.u32 %s1089_s9, 4  ;;  %s1000_s11 = int_to_ptr.vmem [resolvable:$false] %s999_s11 }
  0x53   : > { %425 = vmatpush1.msra.mxu0 %v406_v4  ;;  %v398_v12 = vld [vmem:[#allocation6 + $0xa0] sm:$0xff]  ;;  %v397_v13 = vld [vmem:[#allocation6 + $0x98] sm:$0xff]  ;;  %v396_v14 = vld [vmem:[#allocation6 + $0x90] sm:$0xff]  ;;  %v413_v3 = vshrl.u32 %v412_v2, 7  ;;  %p996_p8 = scmp.ne.s32.totalorder %s657_s20, %s995_s3  ;;  %s1001_s27 = scalar_lea.vmem %s1000_s11, 256 }
  0x54   : > { %426 = vmatprep.subr.mxu0 %v405_v5  ;;  %v527_v15 = vld [vmem:[#allocation8 + $0xf8] sm:$0xff]  ;;  %v526_v17 = vld [vmem:[#allocation8 + $0xf0] sm:$0xff]  ;;  %v395_v18 = vld [vmem:[#allocation6 + $0x88] sm:$0xff]  ;;  %p1002_p2 = scmp.lt.s32.totalorder %s657_s20, %s1000_s11  ;;  %p1003_p13 = scmp.lt.s32.totalorder %s1001_s27, %s995_s3 }
  0x55   : > { %427 = vmatpush1.msra.mxu0 %v404_v6  ;;  %v511_v16 = vld [vmem:[#allocation8 + $0x78] sm:$0xff]  ;;  %790 = vmatprep.subr.mxu1 %v527_v15  ;;  %v510_v19 = vld [vmem:[#allocation8 + $0x70] sm:$0xff]  ;;  %v394_v20 = vld [vmem:[#allocation6 + $0x80] sm:$0xff]  ;;  %v414_v4 = vsub.s32 0, %v413_v3  ;;  %v418_v6 = vsub.s32 1, %v413_v3  ;;  %p997_p9 = pnand %p996_p8, %p1225_p7 }
  0x56   : > { %428 = vmatprep.subr.mxu0 %v403_v7  ;;  %791 = vmatpush3.msra.mxu1 %v511_v16  ;;  %v525_v21 = vld [vmem:[#allocation8 + $0xe8] sm:$0xff]  ;;  %v393_v22 = vld [vmem:[#allocation6 + $0x78] sm:$0xff]  ;;  %v392_v24 = vld [vmem:[#allocation6 + $0x70] sm:$0xff]  ;;  %p1004_p0 = por %p1003_p13, %p1002_p2 }
  0x57   : > { %429 = vmatpush1.msra.mxu0 %v402_v8  ;;  %792 = vmatprep.subr.mxu1 %v526_v17  ;;  %v509_v23 = vld [vmem:[#allocation8 + $0x68] sm:$0xff]  ;;  %v524_v25 = vld [vmem:[#allocation8 + $0xe0] sm:$0xff]  ;;  %v523_v29 = vld [vmem:[#allocation8 + $0xd8] sm:$0xff]  ;;  %p998_p11 = pneg %p997_p9 }
  0x58   : > { %430 = vmatprep.subr.mxu0 %v401_v9  ;;  %793 = vmatpush3.msra.mxu1 %v510_v19  ;;  %v391_v26 = vld [vmem:[#allocation6 + $0x68] sm:$0xff]  ;;  %v508_v27 = vld [vmem:[#allocation8 + $0x60] sm:$0xff]  ;;  %v389_v30 = vld [vmem:[#allocation6 + $0x58] sm:$0xff] }
  0x59   : > { %431 = vmatpush1.msra.mxu0 %v400_v10  ;;  %794 = vmatprep.subr.mxu1 %v525_v21  ;;  %v390_v28 = vld [vmem:[#allocation6 + $0x60] sm:$0xff]  ;;  %v507_v31 = vld [vmem:[#allocation8 + $0x58] sm:$0xff]  ;;  %v388_v32 = vld [vmem:[#allocation6 + $0x50] sm:$0xff]  ;;  %p1005_p5 = pnand %p1004_p0, %p998_p11 }
  0x5a   : > { %432 = vmatprep.subr.mxu0 %v399_v11  ;;  %795 = vmatpush3.msra.mxu1 %v509_v23  ;;  %v522_v33 = vld [vmem:[#allocation8 + $0xd0] sm:$0xff]  ;;  %v387_v34 = vld [vmem:[#allocation6 + $0x48] sm:$0xff]  ;;  %v386_v36 = vld [vmem:[#allocation6 + $0x40] sm:$0xff] }
  0x5b   : > { %433 = vmatpush1.msra.mxu0 %v398_v12  ;;  %796 = vmatprep.subr.mxu1 %v524_v25  ;;  %v506_v35 = vld [vmem:[#allocation8 + $0x50] sm:$0xff]  ;;  %v521_v37 = vld [vmem:[#allocation8 + $0xc8] sm:$0xff]  ;;  %v385_v38 = vld [vmem:[#allocation6 + $0x38] sm:$0xff] }
  0x5c   : > { %434 = vmatprep.subr.mxu0 %v397_v13  ;;  %797 = vmatpush3.msra.mxu1 %v508_v27  ;;  %v505_v39 = vld [vmem:[#allocation8 + $0x48] sm:$0xff]  ;;  %v384_v40 = vld [vmem:[#allocation6 + $0x30] sm:$0xff]  ;;  %v520_v41 = vld [vmem:[#allocation8 + $0xc0] sm:$0xff] }
  0x5d   : > { %435 = vmatpush1.msra.mxu0 %v396_v14  ;;  %798 = vmatprep.subr.mxu1 %v523_v29  ;;  %v383_v42 = vld [vmem:[#allocation6 + $0x28] sm:$0xff]  ;;  %v504_v43 = vld [vmem:[#allocation8 + $0x40] sm:$0xff]  ;;  %v519_v45 = vld [vmem:[#allocation8 + $0xb8] sm:$0xff] }
  0x5e   : > { %436 = vmatprep.subr.mxu0 %v395_v18  ;;  %799 = vmatpush3.msra.mxu1 %v507_v31  ;;  %v382_v44 = vld [vmem:[#allocation6 + $0x20] sm:$0xff]  ;;  %v381_v46 = vld [vmem:[#allocation6 + $0x18] sm:$0xff]  ;;  %v380_v48 = vld [vmem:[#allocation6 + $0x10] sm:$0xff] }
  0x5f   : > { %437 = vmatpush1.msra.mxu0 %v394_v20  ;;  %800 = vmatprep.subr.mxu1 %v522_v33  ;;  %v503_v47 = vld [vmem:[#allocation8 + $0x38] sm:$0xff]  ;;  %v518_v49 = vld [vmem:[#allocation8 + $0xb0] sm:$0xff]  ;;  %v379_v50 = vld [vmem:[#allocation6 + $0x8] sm:$0xff] }
  0x60   : > { %438 = vmatprep.subr.mxu0 %v393_v22  ;;  %801 = vmatpush3.msra.mxu1 %v506_v35  ;;  %v502_v51 = vld [vmem:[#allocation8 + $0x30] sm:$0xff]  ;;  %v378_v52 = vld [vmem:[#allocation6] sm:$0xff]  ;;  %v517_v53 = vld [vmem:[#allocation8 + $0xa8] sm:$0xff] }
  0x61   : > { %439 = vmatpush1.msra.mxu0 %v392_v24  ;;  %802 = vmatprep.subr.mxu1 %v521_v37  ;;  %v377_v54 = vld [vmem:[%s1258_s19] sm:$0xff]  ;;  %v501_v55 = vld [vmem:[#allocation8 + $0x28] sm:$0xff]  ;;  %v516_v56 = vld [vmem:[#allocation8 + $0xa0] sm:$0xff]  ;;  %s654_s19 = scalar_lea.hbm %s1330_s7, %s787_s10 }
  0x62   : > { %440 = vmatprep.subr.mxu0 %v391_v26  ;;  %803 = vmatpush3.msra.mxu1 %v505_v39  ;;  %v500_v57 = vld [vmem:[#allocation8 + $0x20] sm:$0xff]  ;;  %v515_v58 = vld [vmem:[#allocation8 + $0x98] sm:$0xff]  ;;  %v514_v60 = vld [vmem:[#allocation8 + $0x90] sm:$0xff] }
  0x63   : > { %441 = vmatpush1.msra.mxu0 %v390_v28  ;;  %804 = vmatprep.subr.mxu1 %v520_v41  ;;  %v499_v59 = vld [vmem:[#allocation8 + $0x18] sm:$0xff]  ;;  %v498_v61 = vld [vmem:[#allocation8 + $0x10] sm:$0xff]  ;;  %v513_v62 = vld [vmem:[#allocation8 + $0x88] sm:$0xff] }
  0x64   : > { %442 = vmatprep.subr.mxu0 %v389_v30  ;;  %805 = vmatpush3.msra.mxu1 %v504_v43  ;;  %v497_v63 = vld [vmem:[#allocation8 + $0x8] sm:$0xff]  ;;  %v512_v0 = vld [vmem:[#allocation8 + $0x80] sm:$0xff]  ;;  %v410_v5 = vld [vmem:[%s1325_s2] sm:$0x3] }
  0x65   : > { %443 = vmatpush1.msra.mxu0 %v388_v32  ;;  %806 = vmatprep.subr.mxu1 %v519_v45  ;;  %v496_v1 = vld [vmem:[#allocation8] sm:$0xff]  ;;  %v415_v7 = vrot.slane %v410_v5, %v414_v4  ;;  %v419_v8 = vrot.slane %v410_v5, %v418_v6  ;;  %v783_v18 = vld [vmem:[%s1327_s4] ss:$0 sm:$0xff] }
  0x66   : > { %444 = vmatprep.subr.mxu0 %v387_v34  ;;  %807 = vmatpush3.msra.mxu1 %v503_v47  ;;  %v784_v29 = vld [vmem:[%s1328_s5] ss:$0 sm:$0xff] }
  0x67   : > { %445 = vmatpush1.msra.mxu0 %v386_v36  ;;  %808 = vmatprep.subr.mxu1 %v518_v49  ;;  %v785_v31 = vld [vmem:[%s1329_s6] ss:$0 sm:$0xff] }
  0x68   : > { %446 = vmatprep.subr.mxu0 %v385_v38  ;;  %809 = vmatpush3.msra.mxu1 %v502_v51 }
  0x69   : > { %447 = vmatpush1.msra.mxu0 %v384_v40  ;;  %810 = vmatprep.subr.mxu1 %v517_v53 }
  0x6a   : > { %448 = vmatprep.subr.mxu0 %v383_v42  ;;  %811 = vmatpush3.msra.mxu1 %v501_v55 }
  0x6b   : > { %449 = vmatpush1.msra.mxu0 %v382_v44  ;;  %812 = vmatprep.subr.mxu1 %v516_v56 }
  0x6c   : > { %450 = vmatprep.subr.mxu0 %v381_v46  ;;  %813 = vmatpush3.msra.mxu1 %v500_v57 }
  0x6d   : > { %451 = vmatpush1.msra.mxu0 %v380_v48  ;;  %814 = vmatprep.subr.mxu1 %v515_v58 }
  0x6e   : > { %452 = vmatprep.subr.mxu0 %v379_v50  ;;  %815 = vmatpush3.msra.mxu1 %v499_v59 }
  0x6f   : > { %453 = vmatpush1.msra.mxu0 %v378_v52  ;;  %816 = vmatprep.subr.mxu1 %v514_v60 }
  0x70   : > { %487 = vmatmul.mubr.f32.vlgmr.msra.gmra.mxu0 %v377_v54  ;;  %817 = vmatpush3.msra.mxu1 %v498_v61 }
  0x71   : > { %818 = vmatprep.subr.mxu1 %v513_v62 }
  0x72   : > { %819 = vmatpush3.msra.mxu1 %v497_v63 }
  0x73   : > { %820 = vmatprep.subr.mxu1 %v512_v0 }
  0x74   : > { %821 = vmatpush3.msra.mxu1 %v496_v1 }
 0x130   : > { %v488_v9 = vpop.f32.mrf.mxu0 }
 0x131   : > { %v489_v10 = vadd.f32 %v488_v9, %v415_v7 }
 0x132   : > { %v490_v11 = vpop.f32.mrf.mxu0 }
 0x133   : > { %v491_v12 = vadd.f32 %v490_v11, %v419_v8  ;;  %v493_v14 = vmax.f32 %v489_v10, 0.0 }
 0x135   : > { %v494_v13 = vmax.f32 %v491_v12, 0.0 }
 0x137   : > { %592 = vmatprep.mubr.f32.mxu1 %v494_v13 }
 0x138   : > { %593 = vmatmul.mubr.f32.vlgmr.msra.gmra.mxu1 %v493_v14 }
 0x1f8   : > { %v822_v15 = vpop.f32.mrf.mxu1 }
 0x1fa   : > { %v823_v16 = vpop.f32.mrf.mxu1 }
 0x1fb   : > { %v824_v17 = vadd.f32 %v823_v16, %v822_v15 }
 0x1fd   : > { %v604_v19 = vadd.f32 %v824_v17, %v377_v54 }
 0x1ff   : > { %v612_v20 = vadd.f32 %v783_v18, %v604_v19 }
 0x201   : > { %613 = vadd.xlane.f32.xlu0 %v612_v20 }
 0x28a   : > { %v614_v21 = vpop.xlane.xlu0 %613 }
 0x28b   : > { %v616_v22 = vmul.f32 0.0078125, %v614_v21 }
 0x28d   : > { %v617_v23 = vsub.f32 %v612_v20, %v616_v22 }
 0x28f   : > { %v618_v24 = vmul.f32 %v617_v23, %v617_v23 }
 0x291   : > { %619 = vadd.xlane.f32.xlu0 %v618_v24 }
 0x31a   : > { %v620_v25 = vpop.xlane.xlu0 %619 }
 0x31b   : > { %v621_v26 = vmul.f32 0.0078125, %v620_v25 }
 0x31d   : > { %v622_v27 = vadd.f32 1e-05, %v621_v26 }
 0x31f   : > { %913 = vrsqrt.f32 %v622_v27 }
 0x32c   : > { %v914_v28 = vpop.eup %913 }
 0x32d   : > { %v624_v30 = vmul.f32 %v914_v28, %v617_v23 }
 0x32f   : > { %v632_v32 = vmul.f32 %v784_v29, %v624_v30 }
 0x331   : > { %v640_v33 = vadd.f32 %v785_v31, %v632_v32 }
 0x333   : > { %641 = vst [vmem:[%s364_s16] sm:$0xff] %v640_v33 }
 0x334   : > { %1008 = shalt.err (!%p1005_p5)
}
 0x335   : > { %s1009_s18 = scalar_lea.hbm %s654_s19, 128  ;;  %s1013_s14 = scalar_lea.hbm %s1330_s7, 256 }
 0x336   : > { %p1010_p10 = scmp.ne.s32.totalorder %s654_s19, %s1009_s18  ;;  %p1014_p6 = scmp.lt.s32.totalorder %s654_s19, %s1330_s7 }
 0x337   : > { %p1015_p12 = scmp.lt.s32.totalorder %s1013_s14, %s1009_s18 }
 0x338   : > { %p1011_p1 = pnand %p1010_p10, %p1225_p7 }
 0x339   : > { %p1016_p3 = por %p1015_p12, %p1014_p6 }
 0x33a   : > { %p1012_p4 = pneg %p1011_p1 }
 0x33c   : > { %p1017_p8 = pnand %p1016_p3, %p1012_p4 }
 0x33e   : > { %1020 = shalt.err (!%p1017_p8)
}
 0x33f   : > { %835 = dma.vmem_to_hbm [thread:$0]  (%p1225_p7), %s657_s20, 128, %s654_s19, %s643_s1  }
 0x340 PF: > { %s668_s10 = sand.u32 1, %s1059_s24   ;;  %p1350_p9 = scmp.ne.s32.totalorder %s1340_s12, 0 }
 0x341   : > { %p1351_p11 = scmp.ge.s32.totalorder %s1079_s29, 2  ;;  %s669_s16 = scalar_lea.sflag [#allocation5], %s668_s10 }
 0x343   : > { %p849_p2 = pnand %p1351_p11, %p1350_p9 }
 0x345   : > { %p850_p13 = pneg %p849_p2 }
 0x347   : > { %1054 = dma.done.wait (%p850_p13), %s669_s16, 128  }
 0x348   : > { %1056 = vsyncadd (%p850_p13), %s669_s16, 4294967168  ;;  %s24_s29 = sadd.s32 1, %s1079_s29   ;;  %s1352_s21 = sld [smem:[#allocation13_spill]] }
 0x349   : > { %p21_p0 = scmp.ge.s32.totalorder %s24_s29, 4   ;;  %s1353_s24 = smov %s1063_s25 }
 0x34a   : > { %s1354_s25 = smov %s1067_s26  ;;  %s1355_s26 = smov %s1234_s30 }
 0x34b   : > { %s1356_s27 = smov %s1075_s28  ;;  %23 = sbr.rel (!%p21_p0) target bundleno = 10 (0xa), region = 114 }
 0x34e   : > { %s1357_s28 = smov %s1352_s21 }
 0x350   :  { %674 = vsyncpa [#allocation4], 1 }
 0x351   :  { %676 = vsyncpa [#allocation4 + $0x1], 1 }
 0x352   :  { %677 = vsyncpa [#allocation7], 1 }
 0x353   :  { %678 = vsyncpa [#allocation5], 1 }
 0x354   :  { %680 = vsyncpa [#allocation5 + $0x1], 1 }

</bundles_post_ra>
